<compile_context>
chip_gen: v6e
topology: v6e:2x2x1
jax: 0.10.0
libtpu: 0.0.40
codegen_flags: <defaults>
</compile_context>

<pallas_src>
import functools

import jax
import jax.numpy as jnp
from jax.experimental import pallas as pl
from jax.experimental.pallas import tpu as pltpu


def _pad_copy_kernel(x_ref, o_ref, *, add):
    """stride == 1: pure channel pad on a lane-dense (nb, C, H*W) block."""
    xv = x_ref[...]                                            # (nb, C_in, H*W)
    if add > 0:
        pad = jnp.zeros((xv.shape[0], add, xv.shape[2]), xv.dtype)
        o_ref[...] = jnp.concatenate([xv, pad], axis=1)        # (nb, C_out, H*W)
    else:
        o_ref[...] = xv


def _pad_subsample_kernel(x_ref, o_ref, *, add, stride, h_out, w_out):
    """stride > 1: channel pad + spatial subsample on a (nb, C_in, H, W) block."""
    x = x_ref[...]                                             # (nb, C_in, H, W)

    # Row (sublane-dim) subsample first so the lane-dim slicing below touches
    # only the kept rows.  Both chains are bounded by h_out / w_out and run
    # once per large block, on VALU/XLU slots that have slack in this
    # DMA-bound kernel.
    rows = [x[:, :, r * stride:r * stride + 1, :] for r in range(h_out)]
    xs = rows[0] if h_out == 1 else jnp.concatenate(rows, axis=2)   # (nb,C_in,h_out,W)

    cols = [xs[:, :, :, c * stride:c * stride + 1] for c in range(w_out)]
    y = cols[0] if w_out == 1 else jnp.concatenate(cols, axis=3)    # (nb,C_in,h_out,w_out)

    if add > 0:
        pad = jnp.zeros((y.shape[0], add, h_out, w_out), y.dtype)
        y = jnp.concatenate([y, pad], axis=1)                       # (nb,C_out,h_out,w_out)
    o_ref[...] = y


def identity_padding(x, out_channels, stride, *, vmem_target_bytes=2 * 1024 * 1024):
    """NCHW, identical semantics to the PyTorch module's forward."""
    n, c_in, h, w = x.shape
    add = out_channels - c_in
    assert add >= 0, "IdentityPadding only appends channels"
    # MaxPool2d(kernel_size=1, stride=s), floor mode == x[:, :, ::s, ::s].
    h_out = (h - 1) // stride + 1
    w_out = (w - 1) // stride + 1

    # Batch-block size: keep (input block + output block) around ~2 MiB so the
    # double-buffered pipeline stays well inside the scoped VMEM limit on every
    # chip (v7x has only 64 MiB physical VMEM per TensorCore).
    itemsize = jnp.dtype(x.dtype).itemsize
    per_batch_bytes = (c_in * h * w + out_channels * h_out * w_out) * itemsize
    nb = max(1, min(n, vmem_target_bytes // max(per_batch_bytes, 1)))
    if n >= 2:
        # Keep at least 2 grid steps so the parallel axis shards across both
        # v7x TensorCores (neutral on v5e/v6e).
        nb = min(nb, pl.cdiv(n, 2))
    grid = (pl.cdiv(n, nb),)

    compiler_params = pltpu.CompilerParams(
        dimension_semantics=("parallel",),
        vmem_limit_bytes=32 * 1024 * 1024,
    )

    if stride == 1:
        # Pure channel pad: flatten spatial dims in the wrapper (free,
        # contiguous reshape) so loads and stores are lane-dense (last dim H*W).
        xf = x.reshape(n, c_in, h * w)
        kern = functools.partial(_pad_copy_kernel, add=add)
        out = pl.pallas_call(
            kern,
            out_shape=jax.ShapeDtypeStruct((n, out_channels, h * w), x.dtype),
            grid=grid,
            in_specs=[pl.BlockSpec((nb, c_in, h * w), lambda i: (i, 0, 0))],
            out_specs=pl.BlockSpec((nb, out_channels, h * w), lambda i: (i, 0, 0)),
            compiler_params=compiler_params,
        )(xf)
        return out.reshape(n, out_channels, h, w)

    kern = functools.partial(
        _pad_subsample_kernel, add=add, stride=stride, h_out=h_out, w_out=w_out)
    return pl.pallas_call(
        kern,
        out_shape=jax.ShapeDtypeStruct((n, out_channels, h_out, w_out), x.dtype),
        grid=grid,
        # Input spec covers only the real C_in channels: padded output channels
        # never trigger an HBM read.
        in_specs=[pl.BlockSpec((nb, c_in, h, w), lambda i: (i, 0, 0, 0))],
        out_specs=pl.BlockSpec((nb, out_channels, h_out, w_out),
                               lambda i: (i, 0, 0, 0)),
        compiler_params=compiler_params,
    )(x)


def identity_padding_ref(x, out_channels, stride):
    """Pure-JAX reference matching the PyTorch forward exactly."""
    n, c_in, h, w = x.shape
    out = jnp.pad(x, ((0, 0), (0, out_channels - c_in), (0, 0), (0, 0)))
    return out[:, :, ::stride, ::stride]


if __name__ == "__main__":
    key = jax.random.PRNGKey(0)
    # Small shapes consistent with the module: N=2, C_in=4 -> C_out=8, 16x16 spatial.
    N, C_IN, H, W = 2, 4, 16, 16
    C_OUT, STRIDE = 8, 2

    x = jax.random.normal(key, (N, C_IN, H, W), dtype=jnp.float32)

    # stride > 1 path (channel pad + spatial subsample).
    out = jax.block_until_ready(identity_padding(x, C_OUT, STRIDE))
    ref = identity_padding_ref(x, C_OUT, STRIDE)
    assert out.shape == ref.shape, (out.shape, ref.shape)
    assert jnp.allclose(out, ref), "mismatch vs reference (stride=2)"

    # stride == 1 fast path (pure channel pad, lane-dense layout).
    out1 = jax.block_until_ready(identity_padding(x, C_OUT, 1))
    ref1 = identity_padding_ref(x, C_OUT, 1)
    assert out1.shape == ref1.shape, (out1.shape, ref1.shape)
    assert jnp.allclose(out1, ref1), "mismatch vs reference (stride=1)"

    print("KERNEL_OK")
</pallas_src>

<mosaic_0001>
module attributes {stable_mosaic.version = 11 : i64} {
  func.func @_pad_subsample_kernel(%arg0: i32, %arg1: memref<1x4x16x16xf32, #tpu.memory_space<vmem>>, %arg2: memref<1x8x8x8xf32, #tpu.memory_space<vmem>>) attributes {dimension_semantics = [#tpu.dimension_semantics<parallel>], iteration_bounds = array<i64: 2>, scalar_prefetch = 0 : i64, scratch_operands = 0 : i64, tpu.core_type = #tpu.core_type<tc>, window_params = [{transform_indices = @transform_0, window_bounds = array<i64: 1, 4, 16, 16>}, {transform_indices = @transform_1, window_bounds = array<i64: 1, 8, 8, 8>}]} {
    %c0 = arith.constant 0 : index
    %c0_0 = arith.constant 0 : index
    %c0_1 = arith.constant 0 : index
    %c0_2 = arith.constant 0 : index
    %0 = vector.load %arg1[%c0, %c0_0, %c0_1, %c0_2] : memref<1x4x16x16xf32, #tpu.memory_space<vmem>>, vector<1x4x16x16xf32>
    %1 = vector.extract_strided_slice %0 {offsets = [0, 0, 0, 0], sizes = [1, 4, 1, 16], strides = [1, 1, 1, 1]} : vector<1x4x16x16xf32> to vector<1x4x1x16xf32>
    %2 = vector.extract_strided_slice %0 {offsets = [0, 0, 2, 0], sizes = [1, 4, 1, 16], strides = [1, 1, 1, 1]} : vector<1x4x16x16xf32> to vector<1x4x1x16xf32>
    %3 = vector.extract_strided_slice %0 {offsets = [0, 0, 4, 0], sizes = [1, 4, 1, 16], strides = [1, 1, 1, 1]} : vector<1x4x16x16xf32> to vector<1x4x1x16xf32>
    %4 = vector.extract_strided_slice %0 {offsets = [0, 0, 6, 0], sizes = [1, 4, 1, 16], strides = [1, 1, 1, 1]} : vector<1x4x16x16xf32> to vector<1x4x1x16xf32>
    %5 = vector.extract_strided_slice %0 {offsets = [0, 0, 8, 0], sizes = [1, 4, 1, 16], strides = [1, 1, 1, 1]} : vector<1x4x16x16xf32> to vector<1x4x1x16xf32>
    %6 = vector.extract_strided_slice %0 {offsets = [0, 0, 10, 0], sizes = [1, 4, 1, 16], strides = [1, 1, 1, 1]} : vector<1x4x16x16xf32> to vector<1x4x1x16xf32>
    %7 = vector.extract_strided_slice %0 {offsets = [0, 0, 12, 0], sizes = [1, 4, 1, 16], strides = [1, 1, 1, 1]} : vector<1x4x16x16xf32> to vector<1x4x1x16xf32>
    %8 = vector.extract_strided_slice %0 {offsets = [0, 0, 14, 0], sizes = [1, 4, 1, 16], strides = [1, 1, 1, 1]} : vector<1x4x16x16xf32> to vector<1x4x1x16xf32>
    %9 = tpu.concatenate %1, %2, %3, %4, %5, %6, %7, %8 in 2 : vector<1x4x1x16xf32>, vector<1x4x1x16xf32>, vector<1x4x1x16xf32>, vector<1x4x1x16xf32>, vector<1x4x1x16xf32>, vector<1x4x1x16xf32>, vector<1x4x1x16xf32>, vector<1x4x1x16xf32> -> vector<1x4x8x16xf32>
    %10 = vector.extract_strided_slice %9 {offsets = [0, 0, 0, 0], sizes = [1, 4, 8, 1], strides = [1, 1, 1, 1]} : vector<1x4x8x16xf32> to vector<1x4x8x1xf32>
    %11 = vector.extract_strided_slice %9 {offsets = [0, 0, 0, 2], sizes = [1, 4, 8, 1], strides = [1, 1, 1, 1]} : vector<1x4x8x16xf32> to vector<1x4x8x1xf32>
    %12 = vector.extract_strided_slice %9 {offsets = [0, 0, 0, 4], sizes = [1, 4, 8, 1], strides = [1, 1, 1, 1]} : vector<1x4x8x16xf32> to vector<1x4x8x1xf32>
    %13 = vector.extract_strided_slice %9 {offsets = [0, 0, 0, 6], sizes = [1, 4, 8, 1], strides = [1, 1, 1, 1]} : vector<1x4x8x16xf32> to vector<1x4x8x1xf32>
    %14 = vector.extract_strided_slice %9 {offsets = [0, 0, 0, 8], sizes = [1, 4, 8, 1], strides = [1, 1, 1, 1]} : vector<1x4x8x16xf32> to vector<1x4x8x1xf32>
    %15 = vector.extract_strided_slice %9 {offsets = [0, 0, 0, 10], sizes = [1, 4, 8, 1], strides = [1, 1, 1, 1]} : vector<1x4x8x16xf32> to vector<1x4x8x1xf32>
    %16 = vector.extract_strided_slice %9 {offsets = [0, 0, 0, 12], sizes = [1, 4, 8, 1], strides = [1, 1, 1, 1]} : vector<1x4x8x16xf32> to vector<1x4x8x1xf32>
    %17 = vector.extract_strided_slice %9 {offsets = [0, 0, 0, 14], sizes = [1, 4, 8, 1], strides = [1, 1, 1, 1]} : vector<1x4x8x16xf32> to vector<1x4x8x1xf32>
    %18 = tpu.concatenate %10, %11, %12, %13, %14, %15, %16, %17 in 3 : vector<1x4x8x1xf32>, vector<1x4x8x1xf32>, vector<1x4x8x1xf32>, vector<1x4x8x1xf32>, vector<1x4x8x1xf32>, vector<1x4x8x1xf32>, vector<1x4x8x1xf32>, vector<1x4x8x1xf32> -> vector<1x4x8x8xf32>
    %cst = arith.constant 0.000000e+00 : f32
    %19 = vector.broadcast %cst : f32 to vector<1x4x8x8xf32>
    %20 = tpu.concatenate %18, %19 in 1 : vector<1x4x8x8xf32>, vector<1x4x8x8xf32> -> vector<1x8x8x8xf32>
    %c0_3 = arith.constant 0 : index
    %c0_4 = arith.constant 0 : index
    %c0_5 = arith.constant 0 : index
    %c0_6 = arith.constant 0 : index
    %21 = vector.load %arg2[%c0_3, %c0_4, %c0_5, %c0_6] : memref<1x8x8x8xf32, #tpu.memory_space<vmem>>, vector<1x8x8x8xf32>
    tpu.vector_store %arg2[%c0_3, %c0_4, %c0_5, %c0_6], %20 {strides = array<i32>} : memref<1x8x8x8xf32, #tpu.memory_space<vmem>>, vector<1x8x8x8xf32>,
    return
  }
  func.func @transform_0(%arg0: i32) -> (i32, i32, i32, i32) {
    %c0_i32 = arith.constant 0 : i32
    %c0_i32_0 = arith.constant 0 : i32
    %c0_i32_1 = arith.constant 0 : i32
    %c0_i32_2 = arith.constant 0 : i32
    return %arg0, %c0_i32, %c0_i32_0, %c0_i32_1 : i32, i32, i32, i32
  }
  func.func @transform_1(%arg0: i32) -> (i32, i32, i32, i32) {
    %c0_i32 = arith.constant 0 : i32
    %c0_i32_0 = arith.constant 0 : i32
    %c0_i32_1 = arith.constant 0 : i32
    %c0_i32_2 = arith.constant 0 : i32
    return %arg0, %c0_i32, %c0_i32_0, %c0_i32_1 : i32, i32, i32, i32
  }
}

</mosaic_0001>

<bundles_post_ra>
// kernel: tpu_custom_call.1
= control target key start
LH: loop header
LB: loop body
LE: loop exit
PB: predicated region body
PF: predicated region fallthrough
CT: control target
= control target key end

     0   :  { %6 = vsyncpa [#allocation3], 0  ;;  %s936_s0 = inlined_call_operand.hbm [shape: f32[2,4,16,16], index: 0, kind: input, shape index: {}]   ;;  %s937_s1 = inlined_call_operand.hbm [shape: f32[2,8,8,8], index: 1, kind: output, shape index: {}]  }
   0x1   :  { %8 = vsyncpa [#allocation3 + $0x1], 0 }
   0x2   :  { %9 = vsyncpa [#allocation4], 0 }
   0x3   :  { %11 = vsyncpa [#allocation4 + $0x1], 0  ;;  %s653_s6 = smov 0   ;;  %s655_s7 = smov 0  }
   0x4   :  { %s657_s8 = smov 0   ;;  %s659_s9 = smov 0  }
   0x5 LB: > { %s674_s10 = sadd.s32 4294967295, %s627_s9   ;;  %s461_s11 = sadd.s32 4294967294, %s627_s9   ;;  %s627_s9 = sphi %s659_s9, %s952_s9   ;;  %s623_s8 = sphi %s657_s8, %s951_s8   ;;  %s619_s7 = sphi %s655_s7, %s950_s7   ;;  %s615_s6 = sphi %s653_s6, %s949_s6  }
   0x6   : > { %s678_s12 = sadd.s32 1, %s627_s9   ;;  %s24_s13 = sadd.s32 1, %s623_s8 }
   0x7   : > { %s21_s14 = ssub.s32 %s627_s9, %s678_s12  ;;  %p31_p0 = scmp.ne.s32.totalorder %s623_s8, %s619_s7 }
   0x8   : > { %p22_p1 = scmp.eq.s32.totalorder %s21_s14, 0  ;;  %p32_p2 = scmp.eq.s32.totalorder %s627_s9, 0 }
   0x9   : > { %p37_p3 = scmp.ne.s32.totalorder %s619_s7, %s615_s6  ;;  %p38_p4 = scmp.eq.s32.totalorder %s674_s10, 0 }
   0xa   : > { %s690_s15 = scalar_select %p22_p1, %s623_s8, %s24_s13  }
   0xb   : > { %p692_p5 = por %p32_p2, %p31_p0  ;;  %p696_p6 = por %p38_p4, %p37_p3 }
   0xc   : > { %p61_p7 = scmp.eq.s32.totalorder %s674_s10, 1  ;;  %p67_p8 = scmp.eq.s32.totalorder %s461_s11, 1 }
   0xd   : > { %s941_s17 = scalar_select %p696_p6, 1, 0 }
   0xe   : > { %p489_p10 = scmp.lt.s32.totalorder %s627_s9, 2  ;;  %p703_p11 = por %p61_p7, %p31_p0 }
   0xf   : > { %p707_p12 = por %p67_p8, %p37_p3  ;;  %s87_s20 = sand.u32 1, %s623_s8  }
  0x10   : > { %s942_s18 = scalar_select %p703_p11, 1, 0 }
  0x11   : > { %s943_s19 = scalar_select %p707_p12, 1, 0 }
  0x12   : > { %s475_s21 = sshll.u32 %s627_s9, 10  ;;  %s464_s22 = sshll.u32 %s87_s20, 6 }
  0x13   : > { %s716_s25 = scalar_lea.hbm %s936_s0, %s475_s21  ;;  %s91_s26 = scalar_lea.vmem [#allocation2], %s464_s22 }
  0x14   : > { %s98_s27 = sshll.u32 %s91_s26, 4  ;;  %p720_p13 = pnand %p489_p10, %p692_p5  ;;  %s724_s27 = int_to_ptr.vmem [resolvable:$true] %s98_s27 }
  0x15   : > { %s726_s29 = scalar_lea.sflag [#allocation3], %s87_s20  ;;  %s535_s30 = scalar_lea.hbm %s716_s25, 1024 }
  0x16   : > { %p536_p0 = scmp.ne.s32.totalorder %s716_s25, %s535_s30  ;;  %p537_p1 = pneg %p720_p13 }
  0x17   : > { %s540_s4 = scalar_lea.hbm %s936_s0, 2048  ;;  %p541_p4 = scmp.lt.s32.totalorder %s716_s25, %s936_s0 }
  0x18   : > { %p538_p2 = pnand %p537_p1, %p536_p0  ;;  %p542_p5 = scmp.lt.s32.totalorder %s540_s4, %s535_s30 }
  0x1a   : > { %p539_p3 = pneg %p538_p2  ;;  %p543_p7 = por %p542_p5, %p541_p4 }
  0x1c   : > { %p544_p8 = pnand %p543_p7, %p539_p3 }
  0x1e   : > { %547 = shalt.err (!%p544_p8)
}
  0x1f   : > { %s548_s13 = scalar_lea.vmem %s724_s27, 1024  ;;  %s629_s14 = smov [#allocation2]  }
  0x20   : > { %p549_p10 = scmp.ne.s32.totalorder %s724_s27, %s548_s13  ;;  %s553_s16 = sshll.u32 %s629_s14, 4  ;;  %s554_s16 = int_to_ptr.vmem [resolvable:$false] %s553_s16 }
  0x21   : > { %s555_s20 = scalar_lea.vmem %s554_s16, 2048  ;;  %p556_p2 = scmp.lt.s32.totalorder %s724_s27, %s554_s16 }
  0x22   : > { %p551_p9 = pnand %p549_p10, %p537_p1  ;;  %p557_p12 = scmp.lt.s32.totalorder %s555_s20, %s548_s13 }
  0x24   : > { %p552_p0 = pneg %p551_p9  ;;  %p558_p11 = por %p557_p12, %p556_p2 }
  0x26   : > { %p559_p6 = pnand %p558_p11, %p552_p0 }
  0x28   : > { %562 = shalt.err (!%p559_p6)
}
  0x29   : > { %s630_s21 = smov 128   ;;  %s631_s22 = smov 8  }
  0x2a   : > { %484 = dma.hbm_to_vmem [thread:$0]  (!%p720_p13), %s716_s25, 1024, %s724_s27, %s726_s29, %s630_s21, %s630_s21, %s631_s22  }
  0x2b   : > { %p467_p9 = scmp.ge.s32.totalorder %s627_s9, 1  ;;  %p106_p1 = scmp.lt.s32.totalorder %s627_s9, 3 }
  0x2d   : > { %p107_p3 = pnand %p467_p9, %p106_p1 }
  0x2e   : > { %s750_s23 = sand.u32 (!%p107_p3), 1, %s619_s7   ;;  %p945_p6 = scmp.ne.s32.totalorder (!%p107_p3), %s941_s17, 0 }
  0x2f   : > { %110 = sbr.rel (%p107_p3) target bundleno = 250 (0xfa), region = 24  ;;  %s468_s24 = sshll.u32 (!%p107_p3), %s750_s23, 6 }
  0x30   : > { %s113_s26 = scalar_lea.sflag (!%p107_p3), [#allocation3], %s750_s23  ;;  %s756_s30 = scalar_lea.vmem (!%p107_p3), [#allocation2], %s468_s24 }
  0x34   : > { %606 = dma.done.wait (%p945_p6), %s113_s26, 1024  }
  0x35   : > { %608 = vsyncadd (%p945_p6), %s113_s26, 4294966272  ;;  %vm207_vm0 = vcmask 1040384   ;;  %vm212_vm1 = vcmask 1041408   ;;  %vm217_vm2 = vcmask 1042432   ;;  %vm222_vm3 = vcmask 1043456   ;;  %v139_v0 = vld [vmem:[%s756_s30 + $0x20] sm:$0xff] }
  0x36   : > { %v140_v1 = vld [vmem:[%s756_s30 + $0x28] sm:$0xff]  ;;  %vm227_vm4 = vcmask 1044480   ;;  %vm232_vm5 = vcmask 1045504   ;;  %vm237_vm6 = vcmask 1046528   ;;  %v135_v2 = vld [vmem:[%s756_s30] sm:$0xff]  ;;  %v149_v3 = vrot.slane %v139_v0, 1 }
  0x37   : > { %v157_v4 = vrot.slane %v139_v0, 2  ;;  %v165_v5 = vrot.slane %v139_v0, 3  ;;  %v177_v6 = vrot.slane %v140_v1, 4  ;;  %v136_v7 = vld [vmem:[%s756_s30 + $0x8] sm:$0xff]  ;;  %v185_v8 = vrot.slane %v140_v1, 5  ;;  %v141_v12 = vld [vmem:[%s756_s30 + $0x30] sm:$0xff] }
  0x38   : > { %v193_v9 = vrot.slane %v140_v1, 6  ;;  %v201_v10 = vrot.slane %v140_v1, 7  ;;  %v147_v11 = vrot.slane %v135_v2, 1  ;;  %v210_v13 = vsel %vm207_vm0, %v139_v0, %v149_v3  ;;  %v142_v17 = vld [vmem:[%s756_s30 + $0x38] sm:$0xff]  ;;  %v137_v30 = vld [vmem:[%s756_s30 + $0x10] sm:$0xff]  ;;  %s632_s17 = smov 127  }
  0x39   : > { %v155_v14 = vrot.slane %v135_v2, 2  ;;  %v163_v15 = vrot.slane %v135_v2, 3  ;;  %v175_v16 = vrot.slane %v136_v7, 4  ;;  %v215_v18 = vsel %vm212_vm1, %v210_v13, %v157_v4  ;;  %v138_v39 = vld [vmem:[%s756_s30 + $0x18] sm:$0xff]  ;;  %s633_s25 = smov 126   ;;  %s634_s27 = smov 125  }
  0x3a   : > { %v183_v19 = vrot.slane %v136_v7, 5  ;;  %v191_v20 = vrot.slane %v136_v7, 6  ;;  %v199_v21 = vrot.slane %v136_v7, 7  ;;  %v220_v22 = vsel %vm217_vm2, %v215_v18, %v165_v5  ;;  %s635_s28 = smov 124   ;;  %s636_s29 = smov 123  }
  0x3b   : > { %v208_v23 = vsel %vm207_vm0, %v135_v2, %v147_v11  ;;  %v150_v24 = vrot.slane %v141_v12, 1  ;;  %v158_v25 = vrot.slane %v141_v12, 2  ;;  %v225_v26 = vsel %vm222_vm3, %v220_v22, %v177_v6  ;;  %s827_s2 = scalar_lea.vmem [#allocation5], %s468_s24  ;;  %s638_s3 = smov 122  }
  0x3c   : > { %v213_v27 = vsel %vm212_vm1, %v208_v23, %v155_v14  ;;  %v166_v28 = vrot.slane %v141_v12, 3  ;;  %v178_v29 = vrot.slane %v142_v17, 4  ;;  %v230_v31 = vsel %vm227_vm4, %v225_v26, %v185_v8  ;;  %s639_s4 = smov 121   ;;  %s388_s5 = sshll.u32 %s827_s2, 4  ;;  %s879_s5 = int_to_ptr.vmem [resolvable:$true] %s388_s5 }
  0x3d   : > { %v218_v32 = vsel %vm217_vm2, %v213_v27, %v163_v15  ;;  %v186_v33 = vrot.slane %v142_v17, 5  ;;  %v194_v34 = vrot.slane %v142_v17, 6  ;;  %v235_v35 = vsel %vm232_vm5, %v230_v31, %v193_v9  ;;  %s476_s11 = sshll.u32 %s674_s10, 10  ;;  %s375_s16 = scalar_lea.sflag [#allocation4], %s750_s23 }
  0x3e   : > { %v223_v36 = vsel %vm222_vm3, %v218_v32, %v175_v16  ;;  %v202_v37 = vrot.slane %v142_v17, 7  ;;  %v211_v38 = vsel %vm207_vm0, %v141_v12, %v150_v24  ;;  %v782_v40 = vsel %vm237_vm6, %v235_v35, %v201_v10  ;;  %s889_s14 = scalar_lea.hbm %s937_s1, %s476_s11  ;;  %s563_s20 = scalar_lea.vmem %s879_s5, 1024 }
  0x3f   : > { %v228_v41 = vsel %vm227_vm4, %v223_v36, %v183_v19  ;;  %v216_v42 = vsel %vm212_vm1, %v211_v38, %v158_v25  ;;  %v148_v43 = vrot.slane %v137_v30, 1  ;;  %250 = vrot.lane.b32.xlu1 %v782_v40, %s632_s17  ;;  %v156_v46 = vrot.slane %v137_v30, 2  ;;  %p564_p11 = scmp.ne.s32.totalorder %s879_s5, %s563_s20  ;;  %p946_p12 = scmp.ne.s32.totalorder %s942_s18, 0 }
  0x40   : > { %v233_v44 = vsel %vm232_vm5, %v228_v41, %v191_v20  ;;  %v221_v45 = vsel %vm217_vm2, %v216_v42, %v166_v28  ;;  %v164_v47 = vrot.slane %v137_v30, 3  ;;  %v176_v50 = vrot.slane %v138_v39, 4  ;;  %s640_s21 = smov [#allocation5]  }
  0x41   : > { %v790_v48 = vsel %vm237_vm6, %v233_v44, %v199_v21  ;;  %v226_v49 = vsel %vm222_vm3, %v221_v45, %v178_v29  ;;  %v184_v52 = vrot.slane %v138_v39, 5  ;;  %v209_v53 = vsel %vm207_vm0, %v137_v30, %v148_v43  ;;  %p565_p13 = pnand %p564_p11, %p946_p12  ;;  %s567_s22 = sshll.u32 %s640_s21, 4  ;;  %s568_s22 = int_to_ptr.vmem [resolvable:$false] %s567_s22 }
  0x42   : > { %246 = vrot.lane.b32.xlu0 %v790_v48, %s632_s17  ;;  %v231_v51 = vsel %vm227_vm4, %v226_v49, %v186_v33  ;;  %v192_v55 = vrot.slane %v138_v39, 6  ;;  %v214_v56 = vsel %vm212_vm1, %v209_v53, %v156_v46  ;;  %v200_v58 = vrot.slane %v138_v39, 7  ;;  %s569_s24 = scalar_lea.vmem %s568_s22, 2048  ;;  %p570_p5 = scmp.lt.s32.totalorder %s879_s5, %s568_s22 }
  0x43   : > { %v236_v54 = vsel %vm232_vm5, %v231_v51, %v194_v34  ;;  %v219_v59 = vsel %vm217_vm2, %v214_v56, %v164_v47  ;;  %vm365_vm7 = vcmask 64512   ;;  %v637_v0 = vmov 0.0   ;;  %p566_p4 = pneg %p565_p13  ;;  %p571_p7 = scmp.lt.s32.totalorder %s569_s24, %s563_s20 }
  0x44   : > { %v799_v57 = vsel %vm237_vm6, %v236_v54, %v202_v37  ;;  %v224_v60 = vsel %vm222_vm3, %v219_v59, %v176_v50  ;;  %370 = vst.msk [vmem:[%s827_s2 + $0x20] sm:$0xff] %vm365_vm7, %v637_v0  ;;  %371 = vst.msk [vmem:[%s827_s2 + $0x28] sm:$0xff] %vm365_vm7, %v637_v0  ;;  %vm335_vm8 = vcmask 15360   ;;  %vm330_vm9 = vcmask 7168  }
  0x45   : > { %252 = vrot.lane.b32.xlu1 %v799_v57, %s632_s17  ;;  %v229_v61 = vsel %vm227_vm4, %v224_v60, %v184_v52  ;;  %372 = vst.msk [vmem:[%s827_s2 + $0x30] sm:$0xff] %vm365_vm7, %v637_v0  ;;  %373 = vst.msk [vmem:[%s827_s2 + $0x38] sm:$0xff] %vm365_vm7, %v637_v0  ;;  %vm340_vm10 = vcmask 23552   ;;  %vm345_vm11 = vcmask 31744   ;;  %vm350_vm12 = vcmask 39936   ;;  %p572_p8 = por %p571_p7, %p570_p5 }
  0x46   : > { %v234_v62 = vsel %vm232_vm5, %v229_v61, %v192_v55  ;;  %vm355_vm13 = vcmask 48128   ;;  %vm360_vm14 = vcmask 56320  }
  0x47   : > { %v807_v63 = vsel %vm237_vm6, %v234_v62, %v200_v58  ;;  %p573_p10 = pnand %p572_p8, %p566_p4 }
  0x48   : > { %248 = vrot.lane.b32.xlu0 %v807_v63, %s632_s17 }
  0x49   : > { %260 = vrot.lane.b32.xlu1 %v807_v63, %s633_s25 }
  0x4c   : > { %258 = vrot.lane.b32.xlu0 %v790_v48, %s633_s25 }
  0x4d   : > { %264 = vrot.lane.b32.xlu1 %v799_v57, %s633_s25 }
  0x50   : > { %262 = vrot.lane.b32.xlu0 %v782_v40, %s633_s25 }
  0x51   : > { %272 = vrot.lane.b32.xlu1 %v807_v63, %s634_s27 }
  0x54   : > { %270 = vrot.lane.b32.xlu0 %v790_v48, %s634_s27 }
  0x55   : > { %276 = vrot.lane.b32.xlu1 %v799_v57, %s634_s27 }
  0x58   : > { %274 = vrot.lane.b32.xlu0 %v782_v40, %s634_s27 }
  0x59   : > { %284 = vrot.lane.b32.xlu1 %v807_v63, %s635_s28 }
  0x5c   : > { %282 = vrot.lane.b32.xlu0 %v790_v48, %s635_s28 }
  0x5d   : > { %288 = vrot.lane.b32.xlu1 %v799_v57, %s635_s28 }
  0x60   : > { %286 = vrot.lane.b32.xlu0 %v782_v40, %s635_s28 }
  0x61   : > { %296 = vrot.lane.b32.xlu1 %v807_v63, %s636_s29 }
  0x64   : > { %294 = vrot.lane.b32.xlu0 %v790_v48, %s636_s29 }
  0x65   : > { %300 = vrot.lane.b32.xlu1 %v799_v57, %s636_s29 }
  0x68   : > { %298 = vrot.lane.b32.xlu0 %v782_v40, %s636_s29 }
  0x69   : > { %308 = vrot.lane.b32.xlu1 %v807_v63, %s638_s3 }
  0x6c   : > { %306 = vrot.lane.b32.xlu0 %v790_v48, %s638_s3 }
  0x6d   : > { %312 = vrot.lane.b32.xlu1 %v799_v57, %s638_s3 }
  0x70   : > { %310 = vrot.lane.b32.xlu0 %v782_v40, %s638_s3 }
  0x71   : > { %320 = vrot.lane.b32.xlu1 %v807_v63, %s639_s4 }
  0x74   : > { %318 = vrot.lane.b32.xlu0 %v790_v48, %s639_s4 }
  0x75   : > { %324 = vrot.lane.b32.xlu1 %v799_v57, %s639_s4 }
  0x78   : > { %322 = vrot.lane.b32.xlu0 %v782_v40, %s639_s4 }
  0xb1   : > { %v251_v1 = vpop.permute.xlu1 %250 }
  0xb2   : > { %v333_v42 = vsel %vm330_vm9, %v782_v40, %v251_v1 }
  0xb4   : > { %v247_v2 = vpop.permute.xlu0 %246 }
  0xb5   : > { %v331_v28 = vsel %vm330_vm9, %v790_v48, %v247_v2 }
  0xb7   : > { %v253_v3 = vpop.permute.xlu1 %252 }
  0xb8   : > { %v334_v29 = vsel %vm330_vm9, %v799_v57, %v253_v3 }
  0xba   : > { %v249_v4 = vpop.permute.xlu0 %248 }
  0xbb   : > { %v261_v5 = vpop.permute.xlu1 %260  ;;  %v332_v22 = vsel %vm330_vm9, %v807_v63, %v249_v4 }
  0xbc   : > { %v337_v23 = vsel %vm335_vm8, %v332_v22, %v261_v5 }
  0xbe   : > { %v259_v6 = vpop.permute.xlu0 %258 }
  0xbf   : > { %v265_v7 = vpop.permute.xlu1 %264  ;;  %v336_v31 = vsel %vm335_vm8, %v331_v28, %v259_v6 }
  0xc0   : > { %v339_v32 = vsel %vm335_vm8, %v334_v29, %v265_v7 }
  0xc2   : > { %v263_v8 = vpop.permute.xlu0 %262 }
  0xc3   : > { %v273_v9 = vpop.permute.xlu1 %272  ;;  %v338_v45 = vsel %vm335_vm8, %v333_v42, %v263_v8 }
  0xc4   : > { %v342_v26 = vsel %vm340_vm10, %v337_v23, %v273_v9 }
  0xc6   : > { %v271_v10 = vpop.permute.xlu0 %270 }
  0xc7   : > { %v277_v11 = vpop.permute.xlu1 %276  ;;  %v341_v36 = vsel %vm340_vm10, %v336_v31, %v271_v10 }
  0xc8   : > { %v344_v37 = vsel %vm340_vm10, %v339_v32, %v277_v11 }
  0xca   : > { %v275_v12 = vpop.permute.xlu0 %274 }
  0xcb   : > { %v285_v13 = vpop.permute.xlu1 %284  ;;  %v343_v50 = vsel %vm340_vm10, %v338_v45, %v275_v12 }
  0xcc   : > { %v347_v27 = vsel %vm345_vm11, %v342_v26, %v285_v13 }
  0xce   : > { %v283_v14 = vpop.permute.xlu0 %282 }
  0xcf   : > { %v289_v15 = vpop.permute.xlu1 %288  ;;  %v346_v39 = vsel %vm345_vm11, %v341_v36, %v283_v14 }
  0xd0   : > { %v349_v41 = vsel %vm345_vm11, %v344_v37, %v289_v15 }
  0xd2   : > { %v287_v16 = vpop.permute.xlu0 %286 }
  0xd3   : > { %v297_v17 = vpop.permute.xlu1 %296  ;;  %v348_v52 = vsel %vm345_vm11, %v343_v50, %v287_v16 }
  0xd4   : > { %v352_v30 = vsel %vm350_vm12, %v347_v27, %v297_v17 }
  0xd6   : > { %v295_v18 = vpop.permute.xlu0 %294 }
  0xd7   : > { %v301_v19 = vpop.permute.xlu1 %300  ;;  %v351_v43 = vsel %vm350_vm12, %v346_v39, %v295_v18 }
  0xd8   : > { %v354_v44 = vsel %vm350_vm12, %v349_v41, %v301_v19 }
  0xda   : > { %v299_v20 = vpop.permute.xlu0 %298 }
  0xdb   : > { %v309_v21 = vpop.permute.xlu1 %308  ;;  %v353_v53 = vsel %vm350_vm12, %v348_v52, %v299_v20 }
  0xdc   : > { %v357_v33 = vsel %vm355_vm13, %v352_v30, %v309_v21 }
  0xde   : > { %v307_v24 = vpop.permute.xlu0 %306 }
  0xdf   : > { %v313_v25 = vpop.permute.xlu1 %312  ;;  %v356_v46 = vsel %vm355_vm13, %v351_v43, %v307_v24 }
  0xe0   : > { %v359_v47 = vsel %vm355_vm13, %v354_v44, %v313_v25 }
  0xe2   : > { %v311_v34 = vpop.permute.xlu0 %310 }
  0xe3   : > { %v321_v35 = vpop.permute.xlu1 %320  ;;  %v358_v54 = vsel %vm355_vm13, %v353_v53, %v311_v34 }
  0xe4   : > { %v362_v38 = vsel %vm360_vm14, %v357_v33, %v321_v35 }
  0xe5   : > { %367 = vst.msk [vmem:[%s827_s2 + $0x8] sm:$0xff] %vm365_vm7, %v362_v38 }
  0xe6   : > { %v319_v48 = vpop.permute.xlu0 %318 }
  0xe7   : > { %v325_v49 = vpop.permute.xlu1 %324  ;;  %v361_v40 = vsel %vm360_vm14, %v356_v46, %v319_v48 }
  0xe8   : > { %v364_v51 = vsel %vm360_vm14, %v359_v47, %v325_v49  ;;  %366 = vst.msk [vmem:[%s827_s2] sm:$0xff] %vm365_vm7, %v361_v40 }
  0xe9   : > { %369 = vst.msk [vmem:[%s827_s2 + $0x18] sm:$0xff] %vm365_vm7, %v364_v51 }
  0xea   : > { %v323_v55 = vpop.permute.xlu0 %322 }
  0xeb   : > { %v363_v56 = vsel %vm360_vm14, %v358_v54, %v323_v55 }
  0xec   : > { %368 = vst.msk [vmem:[%s827_s2 + $0x10] sm:$0xff] %vm365_vm7, %v363_v56 }
  0xed   : > { %576 = shalt.err (!%p573_p10)
}
  0xee   : > { %s577_s26 = scalar_lea.hbm %s889_s14, 1024  ;;  %s581_s25 = scalar_lea.hbm %s937_s1, 2048 }
  0xef   : > { %p578_p0 = scmp.ne.s32.totalorder %s889_s14, %s577_s26  ;;  %p582_p1 = scmp.lt.s32.totalorder %s889_s14, %s937_s1 }
  0xf0   : > { %p583_p3 = scmp.lt.s32.totalorder %s581_s25, %s577_s26 }
  0xf1   : > { %p579_p2 = pnand %p578_p0, %p946_p12 }
  0xf2   : > { %p584_p6 = por %p583_p3, %p582_p1 }
  0xf3   : > { %p580_p9 = pneg %p579_p2 }
  0xf5   : > { %p585_p11 = pnand %p584_p6, %p580_p9 }
  0xf7   : > { %588 = shalt.err (!%p585_p11)
}
  0xf8   : > { %s641_s29 = smov 128   ;;  %s642_s2 = smov 8  }
  0xf9   : > { %479 = dma.vmem_to_hbm [thread:$0]  (%p946_p12), %s879_s5, 1024, %s889_s14, %s375_s16, %s641_s29, %s641_s29, %s642_s2  }
  0xfa PF: > { %s403_s3 = sand.u32 1, %s615_s6   ;;  %p947_p13 = scmp.ne.s32.totalorder %s943_s19, 0 }
  0xfb   : > { %p948_p4 = scmp.ge.s32.totalorder %s627_s9, 2  ;;  %s404_s4 = scalar_lea.sflag [#allocation4], %s403_s3 }
  0xfd   : > { %p486_p5 = pnand %p948_p4, %p947_p13 }
  0xff   : > { %p487_p7 = pneg %p486_p5 }
 0x101   : > { %610 = dma.done.wait (%p487_p7), %s404_s4, 1024  }
 0x102   : > { %612 = vsyncadd (%p487_p7), %s404_s4, 4294966272  ;;  %p14_p8 = scmp.ge.s32.totalorder %s678_s12, 4   ;;  %s949_s6 = smov %s619_s7 }
 0x103   : > { %s950_s7 = smov %s623_s8  ;;  %s951_s8 = smov %s690_s15 }
 0x104   : > { %s952_s9 = smov %s678_s12  ;;  %16 = sbr.rel (!%p14_p8) target bundleno = 5 (0x5), region = 69 }
 0x109   :  { %409 = vsyncpa [#allocation3], 1 }
 0x10a   :  { %411 = vsyncpa [#allocation3 + $0x1], 1 }
 0x10b   :  { %412 = vsyncpa [#allocation4], 1 }
 0x10c   :  { %414 = vsyncpa [#allocation4 + $0x1], 1 }

</bundles_post_ra>
